<compile_context>
chip_gen: v5e
topology: v5e:2x2
jax: 0.10.0
libtpu: 0.0.40
codegen_flags: <defaults>
</compile_context>

<pallas_src>
import functools

import jax
import jax.numpy as jnp
from jax.experimental import pallas as pl
from jax.experimental.pallas import tpu as pltpu


NUM_CLASSES = 2
N_PAD = 128           # lane-dense padding of the fc2 / softmax / output width
NEG_INF = -1e30       # softmax kill value for padded logits


# ----------------------------------------------------------------------------
# Fused Pallas kernel: one grid step == one batch tile of Bt samples
# ----------------------------------------------------------------------------
def _cnn_fused_kernel(cols_ref, wconv_ref, wpf_ref, fc_b_ref,
                      fc2_w_ref, fc2_b_ref, o_ref, *, bt, howo):
    # conv1 (7x7, stride 2, pad 3, bias=False) as an im2col matmul on the MXU.
    # cols_ref: (Bt*HoWo, Kp) bf16, wconv_ref: (Kp, 64) bf16 -> f32 accumulate.
    feat = jnp.dot(cols_ref[...], wconv_ref[...],
                   preferred_element_type=jnp.float32)        # (Bt*HoWo, 64)

    # AdaptiveAvgPool2d((1,1)) as a sublane (XLU) reduction per sample.
    pooled = jnp.mean(feat.reshape(bt, howo, 64), axis=1)     # (Bt, 64)

    # TODO(synk): the pretrained ResNet backbone (bn1 / maxpool / layer1..4,
    # ImageNet weights from `pretrainedmodels`) is not reproduced; a
    # deterministic bias-free linear 64->512 projection stands in.  Because it
    # is linear it has been (a) commuted with the average pool and (b) folded
    # with fc(512->64) into a single (64,64) weight W_pf on the host.  Revert
    # these reorderings/foldings when a real nonlinear backbone is added.
    h = jnp.dot(pooled.astype(jnp.bfloat16), wpf_ref[...],
                preferred_element_type=jnp.float32) + fc_b_ref[...]  # (Bt, 64)
    h = jnp.maximum(h, 0.0)                                          # ReLU

    # fc2: Linear(64, 2) padded to 128 output lanes; padded lanes carry a
    # -1e30 bias so they vanish in the numerically-stable softmax below.
    z = jnp.dot(h.astype(jnp.bfloat16), fc2_w_ref[...],
                preferred_element_type=jnp.float32) + fc2_b_ref[...]  # (Bt, 128)
    z = z - jnp.max(z, axis=-1, keepdims=True)
    e = jnp.exp(z)
    probs = e / jnp.sum(e, axis=-1, keepdims=True)
    o_ref[...] = probs.reshape(o_ref.shape)


# ----------------------------------------------------------------------------
# Forward wrapper (NCHW in, softmax probs out)
# ----------------------------------------------------------------------------
def cnn_forward(x_nchw, params):
    B, Cin, H, W = x_nchw.shape
    KH = KW = 7
    stride, pad = 2, 3
    Ho = (H + 2 * pad - KH) // stride + 1
    Wo = (W + 2 * pad - KW) // stride + 1
    HoWo = Ho * Wo
    K = Cin * KH * KW
    Kp = ((K + 127) // 128) * 128      # lane-aligned contraction (196 -> 256)
    n_cls = params["fc2_w_t"].shape[1]

    # ---- batch tile size --------------------------------------------------
    # Keep the double-buffered bf16 cols tile under ~8 MiB (safe for v5e's
    # 16 MiB scoped-VMEM default, and well under v6e 32 MiB / v7x 32-of-64).
    vmem_budget = 8 * 1024 * 1024
    bt_cap = max(1, vmem_budget // (2 * HoWo * Kp * 2))
    # Keep >=2 grid steps when B >= 2 so both v7x TensorCores get work.
    Bt = max(1, min(bt_cap, -(-B // 2))) if B >= 2 else 1
    T = -(-B // Bt)
    B_pad = T * Bt

    # ---- im2col patch extraction: layout glue only (MACs run in-kernel) ----
    # Cast to bf16 BEFORE the 12x im2col blow-up to halve its HBM traffic.
    x_bf = x_nchw.astype(jnp.bfloat16)
    if B_pad > B:
        x_bf = jnp.pad(x_bf, ((0, B_pad - B), (0, 0), (0, 0), (0, 0)))
    xp = jnp.pad(x_bf, ((0, 0), (0, 0), (pad, pad), (pad, pad)))
    cols = jnp.stack(
        [xp[:, :, kh:kh + stride * Ho:stride, kw:kw + stride * Wo:stride]
         for kh in range(KH) for kw in range(KW)],
        axis=-1)                                 # (B_pad, Cin, Ho, Wo, KH*KW)
    cols = cols.transpose(0, 2, 3, 1, 4).reshape(B_pad * HoWo, K)
    cols = jnp.pad(cols, ((0, 0), (0, Kp - K)))            # (B_pad*HoWo, Kp)

    # ---- weight preparation (bf16, f32 accumulation in-kernel) -------------
    w_mat = params["conv1_w"].reshape(64, K).T             # (K, 64)
    w_mat = jnp.pad(w_mat, ((0, Kp - K), (0, 0))).astype(jnp.bfloat16)

    # Fold the bias-free linear backbone stand-in with fc: (64,512)@(512,64).
    w_pf = (params["proj_w"] @ params["fc_w_t"]).astype(jnp.bfloat16)  # (64,64)
    fc_b = params["fc_b"].astype(jnp.float32)                          # (1,64)

    # fc2 padded to lane-dense 128 columns; padded bias -> -1e30 (softmax-kill).
    fc2_w = jnp.pad(params["fc2_w_t"],
                    ((0, 0), (0, N_PAD - n_cls))).astype(jnp.bfloat16)
    fc2_b = jnp.concatenate(
        [params["fc2_b"].astype(jnp.float32),
         jnp.full((1, N_PAD - n_cls), NEG_INF, jnp.float32)], axis=-1)

    kernel = functools.partial(_cnn_fused_kernel, bt=Bt, howo=HoWo)

    out = pl.pallas_call(
        kernel,
        out_shape=jax.ShapeDtypeStruct((T, Bt, N_PAD), jnp.float32),
        grid=(T,),
        in_specs=[
            pl.BlockSpec((Bt * HoWo, Kp), lambda t: (t, 0)),   # per-tile cols
            pl.BlockSpec((Kp, 64), lambda t: (0, 0)),          # conv weight
            pl.BlockSpec((64, 64), lambda t: (0, 0)),          # folded proj@fc
            pl.BlockSpec((1, 64), lambda t: (0, 0)),           # fc bias
            pl.BlockSpec((64, N_PAD), lambda t: (0, 0)),       # fc2 weight (padded)
            pl.BlockSpec((1, N_PAD), lambda t: (0, 0)),        # fc2 bias (padded)
        ],
        out_specs=pl.BlockSpec((1, Bt, N_PAD), lambda t: (t, 0, 0)),
        compiler_params=pltpu.CompilerParams(
            dimension_semantics=("parallel",)),                # 2 TCs on v7x
    )(cols, w_mat, w_pf, fc_b, fc2_w, fc2_b)

    return out.reshape(B_pad, N_PAD)[:B, :n_cls]


# ----------------------------------------------------------------------------
# Pure-JAX f32 reference (PyTorch forward order) for tolerance testing
# ----------------------------------------------------------------------------
def cnn_reference(x_nchw, params):
    B, Cin, H, W = x_nchw.shape
    KH = KW = 7
    stride, pad = 2, 3
    Ho = (H + 2 * pad - KH) // stride + 1
    Wo = (W + 2 * pad - KW) // stride + 1
    xp = jnp.pad(x_nchw, ((0, 0), (0, 0), (pad, pad), (pad, pad)))
    cols = jnp.stack(
        [xp[:, :, kh:kh + stride * Ho:stride, kw:kw + stride * Wo:stride]
         for kh in range(KH) for kw in range(KW)],
        axis=-1)
    cols = cols.transpose(0, 2, 3, 1, 4).reshape(B, Ho * Wo, Cin * KH * KW)
    feat = cols @ params["conv1_w"].reshape(64, -1).T          # (B, HoWo, 64)
    f512 = feat @ params["proj_w"]                             # (B, HoWo, 512)
    pooled = jnp.mean(f512, axis=1)                            # avgpool -> (B,512)
    h = jnp.maximum(pooled @ params["fc_w_t"] + params["fc_b"], 0.0)
    z = h @ params["fc2_w_t"] + params["fc2_b"]
    z = z - jnp.max(z, axis=-1, keepdims=True)
    e = jnp.exp(z)
    return e / jnp.sum(e, axis=-1, keepdims=True)


# ----------------------------------------------------------------------------
# Deterministic parameter init (shapes from CNN.__init__)
# ----------------------------------------------------------------------------
def init_params(key, num_electrodes=4):
    ks = jax.random.split(key, 6)
    conv1_w = jax.random.normal(ks[0], (64, num_electrodes, 7, 7), jnp.float32) * 0.05
    proj_w = jax.random.normal(ks[1], (64, 512), jnp.float32) * 0.05   # backbone stand-in
    fc_w = jax.random.normal(ks[2], (64, 512), jnp.float32) * 0.05     # Linear(512,64): (out,in)
    fc_b = jax.random.normal(ks[3], (64,), jnp.float32) * 0.05
    fc2_w = jax.random.normal(ks[4], (2, 64), jnp.float32) * 0.05      # Linear(64,2): (out,in)
    fc2_b = jax.random.normal(ks[5], (2,), jnp.float32) * 0.05
    return dict(
        conv1_w=conv1_w,
        proj_w=proj_w,
        fc_w_t=fc_w.T,                 # (512, 64): y = x @ W.T + b
        fc_b=fc_b.reshape(1, 64),
        fc2_w_t=fc2_w.T,               # (64, 2)
        fc2_b=fc2_b.reshape(1, 2),
    )


if __name__ == "__main__":
    key = jax.random.PRNGKey(0)
    kx, kp = jax.random.split(key)
    # PyTorch-style NCHW input: batch=2, num_electrodes=4, 16x16 spatial
    x = jax.random.normal(kx, (2, 4, 16, 16), jnp.float32)
    params = init_params(kp, num_electrodes=4)

    out = jax.jit(cnn_forward)(x, params)
    out = jax.block_until_ready(out)

    assert out.shape == (2, NUM_CLASSES)
    assert bool(jnp.all(jnp.isfinite(out)))
    # softmax rows sum to 1
    assert bool(jnp.allclose(jnp.sum(out, axis=-1), 1.0, atol=1e-5))
    # bf16-in-kernel result vs. pure-f32 JAX reference (loose tolerance)
    ref = cnn_reference(x, params)
    assert bool(jnp.allclose(out, ref, atol=3e-2))
    print("KERNEL_OK")
</pallas_src>

<mosaic_0001>
module attributes {stable_mosaic.version = 11 : i64} {
  func.func @_cnn_fused_kernel(%arg0: i32, %arg1: memref<64x256xbf16, #tpu.memory_space<vmem>>, %arg2: memref<256x64xbf16, #tpu.memory_space<vmem>>, %arg3: memref<64x64xbf16, #tpu.memory_space<vmem>>, %arg4: memref<1x64xf32, #tpu.memory_space<vmem>>, %arg5: memref<64x128xbf16, #tpu.memory_space<vmem>>, %arg6: memref<1x128xf32, #tpu.memory_space<vmem>>, %arg7: memref<1x1x128xf32, #tpu.memory_space<vmem>>) attributes {dimension_semantics = [#tpu.dimension_semantics<parallel>], iteration_bounds = array<i64: 2>, scalar_prefetch = 0 : i64, scratch_operands = 0 : i64, tpu.core_type = #tpu.core_type<tc>, window_params = [{transform_indices = @transform_0, window_bounds = array<i64: 64, 256>}, {pipeline_mode = #tpu.pipeline_mode<synchronous>, transform_indices = @transform_1, window_bounds = array<i64: 256, 64>}, {pipeline_mode = #tpu.pipeline_mode<synchronous>, transform_indices = @transform_2, window_bounds = array<i64: 64, 64>}, {pipeline_mode = #tpu.pipeline_mode<synchronous>, transform_indices = @transform_3, window_bounds = array<i64: 1, 64>}, {pipeline_mode = #tpu.pipeline_mode<synchronous>, transform_indices = @transform_4, window_bounds = array<i64: 64, 128>}, {pipeline_mode = #tpu.pipeline_mode<synchronous>, transform_indices = @transform_5, window_bounds = array<i64: 1, 128>}, {transform_indices = @transform_6, window_bounds = array<i64: 1, 1, 128>}]} {
    %c0 = arith.constant 0 : index
    %c0_0 = arith.constant 0 : index
    %0 = vector.load %arg1[%c0, %c0_0] : memref<64x256xbf16, #tpu.memory_space<vmem>>, vector<64x256xbf16>
    %c0_1 = arith.constant 0 : index
    %c0_2 = arith.constant 0 : index
    %1 = vector.load %arg2[%c0_1, %c0_2] : memref<256x64xbf16, #tpu.memory_space<vmem>>, vector<256x64xbf16>
    %cst = arith.constant dense<0.000000e+00> : vector<64x64xf32>
    %2 = tpu.matmul %0, %1, %cst {dimension_numbers = #tpu.dot_dimension_numbers<[1], [0], [0], [1], [0, 0, 1, 1], [], []>} : vector<64x256xbf16>, vector<256x64xbf16>, vector<64x64xf32> -> vector<64x64xf32>
    %3 = vector.shape_cast %2 : vector<64x64xf32> to vector<1x64x64xf32>
    %cst_3 = arith.constant dense<0.000000e+00> : vector<1x64xf32>
    %4 = vector.multi_reduction <add>, %3, %cst_3 [1] : vector<1x64x64xf32> to vector<1x64xf32>
    %cst_4 = arith.constant 6.400000e+01 : f32
    %5 = vector.broadcast %cst_4 : f32 to vector<1x64xf32>
    %6 = arith.divf %4, %5 : vector<1x64xf32>
    %7 = arith.truncf %6 : vector<1x64xf32> to vector<1x64xbf16>
    %c0_5 = arith.constant 0 : index
    %c0_6 = arith.constant 0 : index
    %8 = vector.load %arg3[%c0_5, %c0_6] : memref<64x64xbf16, #tpu.memory_space<vmem>>, vector<64x64xbf16>
    %cst_7 = arith.constant dense<0.000000e+00> : vector<1x64xf32>
    %9 = tpu.matmul %7, %8, %cst_7 {dimension_numbers = #tpu.dot_dimension_numbers<[1], [0], [0], [1], [0, 0, 1, 1], [], []>} : vector<1x64xbf16>, vector<64x64xbf16>, vector<1x64xf32> -> vector<1x64xf32>
    %c0_8 = arith.constant 0 : index
    %c0_9 = arith.constant 0 : index
    %10 = vector.load %arg4[%c0_8, %c0_9] : memref<1x64xf32, #tpu.memory_space<vmem>>, vector<1x64xf32>
    %11 = arith.addf %9, %10 : vector<1x64xf32>
    %cst_10 = arith.constant 0.000000e+00 : f32
    %12 = vector.broadcast %cst_10 : f32 to vector<1x64xf32>
    %13 = arith.maximumf %11, %12 : vector<1x64xf32>
    %14 = arith.truncf %13 : vector<1x64xf32> to vector<1x64xbf16>
    %c0_11 = arith.constant 0 : index
    %c0_12 = arith.constant 0 : index
    %15 = vector.load %arg5[%c0_11, %c0_12] : memref<64x128xbf16, #tpu.memory_space<vmem>>, vector<64x128xbf16>
    %cst_13 = arith.constant dense<0.000000e+00> : vector<1x128xf32>
    %16 = tpu.matmul %14, %15, %cst_13 {dimension_numbers = #tpu.dot_dimension_numbers<[1], [0], [0], [1], [0, 0, 1, 1], [], []>} : vector<1x64xbf16>, vector<64x128xbf16>, vector<1x128xf32> -> vector<1x128xf32>
    %c0_14 = arith.constant 0 : index
    %c0_15 = arith.constant 0 : index
    %17 = vector.load %arg6[%c0_14, %c0_15] : memref<1x128xf32, #tpu.memory_space<vmem>>, vector<1x128xf32>
    %18 = arith.addf %16, %17 : vector<1x128xf32>
    %cst_16 = arith.constant dense<0xFF800000> : vector<1xf32>
    %19 = vector.multi_reduction <maximumf>, %18, %cst_16 [1] : vector<1x128xf32> to vector<1xf32>
    %20 = vector.shape_cast %19 : vector<1xf32> to vector<1x1xf32>
    %21 = vector.broadcast %20 : vector<1x1xf32> to vector<1x128xf32>
    %22 = arith.subf %18, %21 : vector<1x128xf32>
    %23 = math.exp %22 : vector<1x128xf32>
    %cst_17 = arith.constant dense<0.000000e+00> : vector<1xf32>
    %24 = vector.multi_reduction <add>, %23, %cst_17 [1] : vector<1x128xf32> to vector<1xf32>
    %25 = vector.shape_cast %24 : vector<1xf32> to vector<1x1xf32>
    %26 = vector.broadcast %25 : vector<1x1xf32> to vector<1x128xf32>
    %27 = arith.divf %23, %26 : vector<1x128xf32>
    %28 = vector.shape_cast %27 : vector<1x128xf32> to vector<1x1x128xf32>
    %c0_18 = arith.constant 0 : index
    %c0_19 = arith.constant 0 : index
    %c0_20 = arith.constant 0 : index
    %29 = vector.load %arg7[%c0_18, %c0_19, %c0_20] : memref<1x1x128xf32, #tpu.memory_space<vmem>>, vector<1x1x128xf32>
    tpu.vector_store %arg7[%c0_18, %c0_19, %c0_20], %28 {strides = array<i32>} : memref<1x1x128xf32, #tpu.memory_space<vmem>>, vector<1x1x128xf32>,
    return
  }
  func.func @transform_0(%arg0: i32) -> (i32, i32) {
    %c0_i32 = arith.constant 0 : i32
    %c0_i32_0 = arith.constant 0 : i32
    return %arg0, %c0_i32 : i32, i32
  }
  func.func @transform_1(%arg0: i32) -> (i32, i32) {
    %c0_i32 = arith.constant 0 : i32
    %c0_i32_0 = arith.constant 0 : i32
    %c0_i32_1 = arith.constant 0 : i32
    return %c0_i32, %c0_i32_0 : i32, i32
  }
  func.func @transform_2(%arg0: i32) -> (i32, i32) {
    %c0_i32 = arith.constant 0 : i32
    %c0_i32_0 = arith.constant 0 : i32
    %c0_i32_1 = arith.constant 0 : i32
    return %c0_i32, %c0_i32_0 : i32, i32
  }
  func.func @transform_3(%arg0: i32) -> (i32, i32) {
    %c0_i32 = arith.constant 0 : i32
    %c0_i32_0 = arith.constant 0 : i32
    %c0_i32_1 = arith.constant 0 : i32
    return %c0_i32, %c0_i32_0 : i32, i32
  }
  func.func @transform_4(%arg0: i32) -> (i32, i32) {
    %c0_i32 = arith.constant 0 : i32
    %c0_i32_0 = arith.constant 0 : i32
    %c0_i32_1 = arith.constant 0 : i32
    return %c0_i32, %c0_i32_0 : i32, i32
  }
  func.func @transform_5(%arg0: i32) -> (i32, i32) {
    %c0_i32 = arith.constant 0 : i32
    %c0_i32_0 = arith.constant 0 : i32
    %c0_i32_1 = arith.constant 0 : i32
    return %c0_i32, %c0_i32_0 : i32, i32
  }
  func.func @transform_6(%arg0: i32) -> (i32, i32, i32) {
    %c0_i32 = arith.constant 0 : i32
    %c0_i32_0 = arith.constant 0 : i32
    %c0_i32_1 = arith.constant 0 : i32
    return %arg0, %c0_i32, %c0_i32_0 : i32, i32, i32
  }
}

</mosaic_0001>

<bundles_post_ra>
// kernel: cnn_forward.1
= control target key start
LH: loop header
LB: loop body
LE: loop exit
PB: predicated region body
PF: predicated region fallthrough
CT: control target
= control target key end

     0   :  { %11 = vsyncpa [#allocation3], 0  ;;  %s1238_s0 = inlined_call_operand.vmem [shape: bf16[128,256], index: 0, kind: input, shape index: {}]   ;;  %s1239_s1 = inlined_call_operand.vmem [shape: bf16[256,64], index: 1, kind: input, shape index: {}]   ;;  %s1240_s2 = inlined_call_operand.vmem [shape: bf16[64,64], index: 2, kind: input, shape index: {}]   ;;  %s1241_s3 = inlined_call_operand.vmem [shape: f32[1,64], index: 3, kind: input, shape index: {}]   ;;  %s1242_s4 = inlined_call_operand.vmem [shape: bf16[64,128], index: 4, kind: input, shape index: {}]   ;;  %s1243_s5 = inlined_call_operand.vmem [shape: f32[1,128], index: 5, kind: input, shape index: {}]   ;;  %s1244_s6 = inlined_call_operand.hbm [shape: f32[2,1,128], index: 6, kind: output, shape index: {}]  }
   0x1   :  { %13 = vsyncpa [#allocation3 + $0x1], 0  ;;  %s1048_s21 = smov 0   ;;  %s1050_s22 = smov 0  }
   0x2   :  { %s1052_s23 = smov 0   ;;  %s1054_s24 = smov 0  }
   0x3 LB: > { %s1069_s25 = sadd.s32 4294967295, %s1010_s24   ;;  %s714_s26 = sadd.s32 4294967294, %s1010_s24   ;;  %s1010_s24 = sphi %s1054_s24, %s1250_s24   ;;  %s1006_s23 = sphi %s1052_s23, %s1249_s23   ;;  %s1002_s22 = sphi %s1050_s22, %s1248_s22   ;;  %s998_s21 = sphi %s1048_s21, %s1247_s21  }
   0x4   : > { %s1073_s27 = sadd.s32 1, %s1010_s24   ;;  %s157_s28 = sadd.s32 1, %s1006_s23 }
   0x5   : > { %s154_s29 = ssub.s32 %s1010_s24, %s1073_s27  ;;  %p167_p0 = scmp.ne.s32.totalorder %s1006_s23, %s1002_s22 }
   0x6   : > { %p155_p1 = scmp.eq.s32.totalorder %s154_s29, 0  ;;  %p168_p2 = scmp.eq.s32.totalorder %s1069_s25, 1 }
   0x7   : > { %p173_p3 = scmp.ne.s32.totalorder %s1002_s22, %s998_s21  ;;  %p174_p4 = scmp.eq.s32.totalorder %s714_s26, 1 }
   0x8   : > { %s1084_s30 = scalar_select %p155_p1, %s1006_s23, %s157_s28  }
   0x9   : > { %p1086_p5 = por %p168_p2, %p167_p0  ;;  %p1090_p6 = por %p174_p4, %p173_p3 }
   0xa   : > { %p717_p7 = scmp.ge.s32.totalorder %s1010_s24, 1  ;;  %p217_p8 = scmp.lt.s32.totalorder %s1010_s24, 3 }
   0xc   : > { %p218_p9 = pnand %p717_p7, %p217_p8 }
   0xd   : > { %s718_s26 = sshll.u32 (!%p218_p9), %s1069_s25, 3  ;;  %s245_s28 = sand.u32 (!%p218_p9), 1, %s1002_s22  }
   0xe   : > { %221 = sbr.rel (%p218_p9) target bundleno = 782 (0x30e), region = 44  ;;  %p248_p10 = scmp.lt.s32.totalorder (!%p218_p9), %s718_s26, 15 }
   0xf   : > { %s655_s10 = scalar_lea.hbm (!%p218_p9), %s1244_s6, %s1069_s25  ;;  %s246_s11 = scalar_lea.vmem (!%p218_p9), [#allocation2], %s245_s28 }
  0x10   : > { %s647_s13 = scalar_lea.sflag (!%p218_p9), [#allocation3], %s245_s28  ;;  %s968_s17 = scalar_lea.hbm (!%p218_p9), %s1244_s6, 2 }
  0x13   : > { %v869_v0 = vld [vmem:[%s1239_s1 + $0x38] sm:$0xff]  ;;  %v868_v2 = vld [vmem:[%s1239_s1 + $0x30] sm:$0xff]  ;;  %v867_v4 = vld [vmem:[%s1239_s1 + $0x28] sm:$0xff]  ;;  %s1252_s26 = smov (!%p248_p10, %s718_s26), 15  ;;  %vm489_vm0 = vcmask 523264   ;;  %v1012_v61 = vmov 64.0  }
  0x14   : > { %v877_v1 = vld [vmem:[%s1239_s1 + $0x78] sm:$0xff]  ;;  %431 = vmatpush.bf16.msra.mxu0 %v869_v0  ;;  %v876_v3 = vld [vmem:[%s1239_s1 + $0x70] sm:$0xff]  ;;  %886 = vmatpush.bf16.msra.mxu2 %v869_v0  ;;  %v875_v5 = vld [vmem:[%s1239_s1 + $0x68] sm:$0xff]  ;;  %s853_s19 = sshll.u32 %s1252_s26, 3  ;;  %942 = vrcp.f32 %v1012_v61  ;;  %vm620_vm2 = vcmask 1040384   ;;  %s659_s26 = sshll.u32 %s655_s10, 4  ;;  %s660_s26 = int_to_ptr.hbm [resolvable:$true] %s659_s26 }
  0x15   : > { %460 = vmatpush.bf16.msra.mxu1 %v877_v1  ;;  %894 = vmatpush.bf16.msra.mxu3 %v877_v1  ;;  %v866_v6 = vld [vmem:[%s1239_s1 + $0x20] sm:$0xff]  ;;  %v865_v8 = vld [vmem:[%s1239_s1 + $0x18] sm:$0xff]  ;;  %v864_v10 = vld [vmem:[%s1239_s1 + $0x10] sm:$0xff]  ;;  %s1142_s12 = scalar_lea.vmem %s1238_s0, %s853_s19  ;;  %s962_s14 = sshra.s32 %s660_s26, 4  ;;  %s963_s14 = int_to_ptr.hbm [resolvable:$true] %s962_s14 }
  0x16   : > { %v874_v7 = vld [vmem:[%s1239_s1 + $0x60] sm:$0xff]  ;;  %v873_v9 = vld [vmem:[%s1239_s1 + $0x58] sm:$0xff]  ;;  %v872_v11 = vld [vmem:[%s1239_s1 + $0x50] sm:$0xff]  ;;  %s964_s15 = scalar_lea.hbm %s963_s14, 1  ;;  %p969_p0 = scmp.lt.s32.totalorder %s963_s14, %s1244_s6 }
  0x17   : > { %v863_v12 = vld [vmem:[%s1239_s1 + $0x8] sm:$0xff]  ;;  %v862_v14 = vld [vmem:[%s1239_s1] sm:$0xff]  ;;  %v747_v20 = vld [vmem:[%s1142_s12 + $0x30] sm:$0xf]  ;;  %p965_p11 = scmp.ne.s32.totalorder %s963_s14, %s964_s15  ;;  %p970_p1 = scmp.lt.s32.totalorder %s968_s17, %s964_s15 }
  0x18   : > { %432 = vmatpush.bf16.msra.mxu0 %v868_v2  ;;  %887 = vmatpush.bf16.msra.mxu2 %v868_v2  ;;  %v871_v13 = vld [vmem:[%s1239_s1 + $0x48] sm:$0xff]  ;;  %v870_v15 = vld [vmem:[%s1239_s1 + $0x40] sm:$0xff]  ;;  %v861_v21 = vld [vmem:[%s1142_s12 + $0x34] sm:$0xf0] }
  0x19   : > { %461 = vmatpush.bf16.msra.mxu1 %v876_v3  ;;  %895 = vmatpush.bf16.msra.mxu3 %v876_v3  ;;  %v723_v16 = vld [vmem:[%s1142_s12] sm:$0xf]  ;;  %v855_v17 = vld [vmem:[%s1142_s12 + $0x4] sm:$0xf0]  ;;  %v854_v18 = vld [vmem:[%s1142_s12 + $0x4] sm:$0xf]  ;;  %v748_v26 = vor.u32 %v861_v21, %v747_v20  ;;  %p966_p12 = pnand %p965_p11, %p1086_p5  ;;  %p971_p2 = por %p970_p1, %p969_p0 }
  0x1a   : > { %v725_v19 = vld [vmem:[%s1142_s12 + $0x8] sm:$0xf0]  ;;  %v860_v22 = vld [vmem:[%s1142_s12 + $0x34] sm:$0xf]  ;;  %v749_v23 = vld [vmem:[%s1142_s12 + $0x38] sm:$0xf0]  ;;  %v724_v24 = vor.u32 %v855_v17, %v723_v16 }
  0x1b   : > { %v728_v25 = vor.u32 %v854_v18, %v725_v19  ;;  %v752_v27 = vor.u32 %v860_v22, %v749_v23  ;;  %v731_v28 = vld [vmem:[%s1142_s12 + $0x10] sm:$0xf]  ;;  %v857_v29 = vld [vmem:[%s1142_s12 + $0x14] sm:$0xf0]  ;;  %v856_v30 = vld [vmem:[%s1142_s12 + $0x14] sm:$0xf]  ;;  %p967_p13 = pneg %p966_p12 }
  0x1c   : > { %433 = vmatpush.bf16.msra.mxu0 %v867_v4  ;;  %888 = vmatpush.bf16.msra.mxu2 %v867_v4  ;;  %v733_v31 = vld [vmem:[%s1142_s12 + $0x18] sm:$0xf0]  ;;  %v732_v32 = vor.u32 %v857_v29, %v731_v28  ;;  %v739_v34 = vld [vmem:[%s1142_s12 + $0x20] sm:$0xf]  ;;  %v859_v35 = vld [vmem:[%s1142_s12 + $0x24] sm:$0xf0] }
  0x1d   : > { %462 = vmatpush.bf16.msra.mxu1 %v875_v5  ;;  %896 = vmatpush.bf16.msra.mxu3 %v875_v5  ;;  %v736_v33 = vor.u32 %v856_v30, %v733_v31  ;;  %v858_v36 = vld [vmem:[%s1142_s12 + $0x24] sm:$0xf]  ;;  %v741_v37 = vld [vmem:[%s1142_s12 + $0x28] sm:$0xf0]  ;;  %v740_v38 = vor.u32 %v859_v35, %v739_v34  ;;  %v881_v46 = vld [vmem:[%s1240_s2 + $0x18] sm:$0xff]  ;;  %s657_s12 = sshll.u32 %s246_s11, 4  ;;  %p972_p3 = pnand %p971_p2, %p967_p13  ;;  %s658_s12 = int_to_ptr.vmem [resolvable:$true] %s657_s12 }
  0x1e   : > { %v744_v39 = vor.u32 %v858_v36, %v741_v37  ;;  %v880_v47 = vld [vmem:[%s1240_s2 + $0x10] sm:$0xff]  ;;  %v879_v50 = vld [vmem:[%s1240_s2 + $0x8] sm:$0xff]  ;;  %v878_v51 = vld [vmem:[%s1240_s2] sm:$0xff] }
  0x1f   : > { %v885_v62 = vld [vmem:[%s1242_s4 + $0x18] sm:$0xff]  ;;  %v884_v3 = vld [vmem:[%s1242_s4 + $0x10] sm:$0xff]  ;;  %v882_v37 = vld [vmem:[%s1242_s4] sm:$0xff] }
  0x20   : > { %434 = vmatpush.bf16.msra.mxu0 %v866_v6  ;;  %889 = vmatpush.bf16.msra.mxu2 %v866_v6 }
  0x21   : > { %463 = vmatpush.bf16.msra.mxu1 %v874_v7  ;;  %897 = vmatpush.bf16.msra.mxu3 %v874_v7 }
  0x24   : > { %435 = vmatpush.bf16.msra.mxu0 %v865_v8  ;;  %890 = vmatpush.bf16.msra.mxu2 %v865_v8 }
  0x25   : > { %464 = vmatpush.bf16.msra.mxu1 %v873_v9  ;;  %898 = vmatpush.bf16.msra.mxu3 %v873_v9  ;;  %v943_v9 = vpop.eup %942 }
  0x26   : > { %v512_v19 = vmul.f32 64.0, %v943_v9  ;;  %vm516_vm1 = vweird.f32 %v943_v9 }
  0x28   : > { %436 = vmatpush.bf16.msra.mxu0 %v864_v10  ;;  %891 = vmatpush.bf16.msra.mxu2 %v864_v10 }
  0x29   : > { %465 = vmatpush.bf16.msra.mxu1 %v872_v11  ;;  %899 = vmatpush.bf16.msra.mxu3 %v872_v11 }
  0x2c   : > { %437 = vmatpush.bf16.msra.mxu0 %v863_v12  ;;  %892 = vmatpush.bf16.msra.mxu2 %v863_v12 }
  0x2d   : > { %466 = vmatpush.bf16.msra.mxu1 %v871_v13  ;;  %900 = vmatpush.bf16.msra.mxu3 %v871_v13  ;;  %v883_v13 = vld [vmem:[%s1242_s4 + $0x8] sm:$0xff] }
  0x30   : > { %438 = vmatpush.bf16.msra.mxu0 %v862_v14  ;;  %893 = vmatpush.bf16.msra.mxu2 %v862_v14 }
  0x31   : > { %467 = vmatpush.bf16.msra.mxu1 %v870_v15  ;;  %901 = vmatpush.bf16.msra.mxu3 %v870_v15 }
  0x33   : > { %439 = vmatmul.bf16.vlgmr.msra.gmra.mxu0 %v724_v24  ;;  %454 = vmatmul.bf16.vlgmr.msra.gmra.mxu2 %v748_v26  ;;  %v513_v24 = vsub.f32 1.0, %v512_v19 }
  0x34   : > { %468 = vmatmul.bf16.vlgmr.msra.gmra.mxu1 %v728_v25  ;;  %483 = vmatmul.bf16.vlgmr.msra.gmra.mxu3 %v752_v27 }
  0x35   : > { %560 = vmatpush.bf16.msrb.mxu2 %v881_v46  ;;  %611 = vmatpush.bf16.msrb.mxu3 %v885_v62  ;;  %v514_v27 = vmul.f32 %v943_v9, %v513_v24 }
  0x37   : > { %v515_v30 = vadd.f32 %v943_v9, %v514_v27 }
  0x39   : > { %561 = vmatpush.bf16.msrb.mxu2 %v880_v47  ;;  %612 = vmatpush.bf16.msrb.mxu3 %v884_v3 }
  0x3d   : > { %562 = vmatpush.bf16.msrb.mxu2 %v879_v50  ;;  %613 = vmatpush.bf16.msrb.mxu3 %v883_v13 }
  0x41   : > { %563 = vmatpush.bf16.msrb.mxu2 %v878_v51  ;;  %614 = vmatpush.bf16.msrb.mxu3 %v882_v37 }
  0x43   : > { %444 = vmatmul.bf16.gmra.mxu0 %v732_v32 }
  0x44   : > { %473 = vmatmul.bf16.gmra.mxu1 %v736_v33  ;;  %v517_v33 = vsel %vm516_vm1, %v943_v9, %v515_v30 }
  0x53   : > { %449 = vmatmul.bf16.gmra.mxu0 %v740_v38  ;;  %v528_v38 = vld [vmem:[%s1241_s3] sm:$0x1] }
  0x54   : > { %478 = vmatmul.bf16.gmra.mxu1 %v744_v39 }
  0xb0   : > { %v440_v40 = vpop.f32.mrf.mxu0 }
  0xb1   : > { %v469_v41 = vpop.f32.mrf.mxu1 }
  0xb2   : > { %v470_v55 = vadd.f32 %v469_v41, %v440_v40 }
  0xb4   : > { %v490_v63 = vsel %vm489_vm0, %v470_v55, 0.0 }
  0xb6   : > { %v455_v53 = vpop.f32.mrf.mxu2 }
  0xb7   : > { %v484_v54 = vpop.f32.mrf.mxu3 }
  0xb8   : > { %v442_v42 = vpop.f32.mrf.mxu0  ;;  %v485_v14 = vadd.f32 %v484_v54, %v455_v53 }
  0xb9   : > { %v471_v43 = vpop.f32.mrf.mxu1 }
  0xba   : > { %v472_v52 = vadd.f32 %v471_v43, %v442_v42  ;;  %v501_v21 = vsel %vm489_vm0, %v485_v14, 0.0 }
  0xbc   : > { %v491_v59 = vsel %vm489_vm0, %v472_v52, 0.0 }
  0xbd   : > { %v492_v2 = vadd.f32 %v491_v59, %v490_v63 }
  0xbe   : > { %v457_v7 = vpop.f32.mrf.mxu2 }
  0xbf   : > { %v486_v8 = vpop.f32.mrf.mxu3 }
  0xc0   : > { %v445_v44 = vpop.f32.mrf.mxu0  ;;  %v487_v17 = vadd.f32 %v486_v8, %v457_v7 }
  0xc1   : > { %v474_v45 = vpop.f32.mrf.mxu1 }
  0xc2   : > { %v475_v56 = vadd.f32 %v474_v45, %v445_v44  ;;  %v503_v23 = vsel %vm489_vm0, %v487_v17, 0.0  ;;  %v579_v44 = vld [vmem:[%s1243_s5] sm:$0x1] }
  0xc4   : > { %v493_v0 = vsel %vm489_vm0, %v475_v56, 0.0 }
  0xc5   : > { %v494_v5 = vadd.f32 %v493_v0, %v492_v2 }
  0xc8   : > { %v447_v48 = vpop.f32.mrf.mxu0 }
  0xc9   : > { %v476_v49 = vpop.f32.mrf.mxu1 }
  0xca   : > { %v477_v60 = vadd.f32 %v476_v49, %v447_v48 }
  0xcc   : > { %v495_v4 = vsel %vm489_vm0, %v477_v60, 0.0 }
  0xcd   : > { %v496_v10 = vadd.f32 %v495_v4, %v494_v5 }
  0xd0   : > { %v450_v57 = vpop.f32.mrf.mxu0 }
  0xd1   : > { %v479_v58 = vpop.f32.mrf.mxu1 }
  0xd2   : > { %v480_v1 = vadd.f32 %v479_v58, %v450_v57 }
  0xd4   : > { %v497_v6 = vsel %vm489_vm0, %v480_v1, 0.0 }
  0xd5   : > { %v498_v16 = vadd.f32 %v497_v6, %v496_v10 }
  0xd8   : > { %v452_v11 = vpop.f32.mrf.mxu0 }
  0xd9   : > { %v481_v12 = vpop.f32.mrf.mxu1 }
  0xda   : > { %v482_v15 = vadd.f32 %v481_v12, %v452_v11 }
  0xdc   : > { %v499_v18 = vsel %vm489_vm0, %v482_v15, 0.0 }
  0xdd   : > { %v500_v20 = vadd.f32 %v499_v18, %v498_v16 }
  0xdf   : > { %v502_v22 = vadd.f32 %v501_v21, %v500_v20 }
  0xe1   : > { %v504_v25 = vadd.f32 %v503_v23, %v502_v22 }
  0xe3   : > { %v505_v26 = vrot.slane %v504_v25, 4 }
  0xe5   : > { %v506_v28 = vadd.f32 %v505_v26, %v504_v25 }
  0xe7   : > { %v507_v29 = vrot.slane %v506_v28, 2 }
  0xe9   : > { %v508_v31 = vadd.f32 %v507_v29, %v506_v28 }
  0xeb   : > { %v509_v32 = vrot.slane %v508_v31, 1 }
  0xed   : > { %v510_v34 = vadd.f32 %v509_v32, %v508_v31 }
  0xef   : > { %v518_v35 = vmul.f32 %v517_v33, %v510_v34 }
  0xf1   : > { %v519_v36 = vpack.c.bf16 %v518_v35, %v518_v35 }
  0xf3   : > { %833 = vmatmul.msk.bf16.vlgmr.msrb.gmra.mxu2 %vm489_vm0, %v519_v36 }
 0x176   : > { %v565_v39 = vpop.f32.mrf.mxu2 }
 0x177   : > { %v566_v40 = vadd.f32 %v565_v39, %v528_v38 }
 0x179   : > { %v569_v41 = vmax.f32 %v566_v40, 0.0 }
 0x17b   : > { %v570_v42 = vpack.c.bf16 %v569_v41, %v569_v41 }
 0x17d   : > { %850 = vmatmul.msk.bf16.vlgmr.msrb.gmra.mxu3 %vm489_vm0, %v570_v42 }
 0x17e   : > { %v567_v43 = vpop.f32.mrf.mxu2 }
 0x200   : > { %v616_v45 = vpop.f32.mrf.mxu3 }
 0x201   : > { %v617_v46 = vadd.f32 %v616_v45, %v579_v44 }
 0x203   : > { %v621_v47 = vsel %vm620_vm2, %v617_v46, -inf }
 0x204   : > { %622 = vmax.xlane.f32.xlu0 %v621_v47 }
 0x208   : > { %v618_v48 = vpop.f32.mrf.mxu3 }
 0x277   : > { %v623_v49 = vpop.xlane.xlu0 %622 }
 0x278   : > { %v624_v50 = vsub.f32 %v617_v46, %v623_v49 }
 0x27a   : > { %v625_v51 = vmul.f32 1.442695, %v624_v50 }
 0x27c   : > { %944 = vpow2.f32 %v625_v51 }
 0x282   : > { %v945_v52 = vpop.eup %944 }
 0x283   : > { %v627_v53 = vsel %vm620_vm2, %v945_v52, 0.0 }
 0x284   : > { %628 = vadd.xlane.f32.xlu0 %v627_v53 }
 0x2f7   : > { %v629_v54 = vpop.xlane.xlu0 %628 }
 0x2f8   : > { %946 = vrcp.f32 %v629_v54  ;;  %v641_v58 = vand.u32 2147483648, %v629_v54  ;;  %v639_v60 = vand.u32 2147483647, %v629_v54  ;;  %vm635_vm4 = vweird.f32 %v629_v54 }
 0x2fa   : > { %v642_v62 = vor.u32 1.1754944e-38, %v641_v58  ;;  %vm640_vm6 = vcmp.eq.f32.partialorder %v639_v60, 8.507059e+37 }
 0x2fe   : > { %v947_v55 = vpop.eup %946 }
 0x2ff   : > { %v631_v56 = vmul.f32 %v947_v55, %v629_v54  ;;  %vm636_vm3 = vweird.f32 %v947_v55 }
 0x300   : > { %vm637_vm5 = vmor %vm635_vm4, %vm636_vm3 }
 0x301   : > { %v632_v57 = vsub.f32 1.0, %v631_v56 }
 0x303   : > { %v633_v59 = vmul.f32 %v947_v55, %v632_v57 }
 0x305   : > { %v634_v61 = vadd.f32 %v947_v55, %v633_v59 }
 0x307   : > { %v638_v63 = vsel %vm637_vm5, %v947_v55, %v634_v61 }
 0x308   : > { %v643_v0 = vsel %vm640_vm6, %v642_v62, %v638_v63 }
 0x309   : > { %v644_v1 = vmul.f32 %v945_v52, %v643_v0 }
 0x30b   : > { %645 = vst [vmem:[%s246_s11] sm:$0x1] %v644_v1 }
 0x30c   : > { %975 = shalt.err (!%p972_p3)
}
 0x30d   : > { %902 = dma.vmem_to_hbm [thread:$0]  (%p1086_p5), %s658_s12, 16, %s660_s26, %s647_s13  }
 0x30e PF: > { %p908_p4 = scmp.ge.s32.totalorder %s1010_s24, 2  ;;  %s671_s20 = sand.u32 1, %s998_s21  }
 0x30f   : > { %s672_s28 = scalar_lea.sflag [#allocation3], %s671_s20 }
 0x310   : > { %p905_p7 = pnand %p908_p4, %p1090_p6 }
 0x312   : > { %p906_p8 = pneg %p905_p7 }
 0x314   : > { %993 = dma.done.wait (%p906_p8), %s672_s28, 16  }
 0x315   : > { %995 = vsyncadd (%p906_p8), %s672_s28, 4294967280  ;;  %p16_p9 = scmp.ge.s32.totalorder %s1073_s27, 4   ;;  %s1247_s21 = smov %s1002_s22 }
 0x316   : > { %s1248_s22 = smov %s1006_s23  ;;  %s1249_s23 = smov %s1084_s30 }
 0x317   : > { %s1250_s24 = smov %s1073_s27  ;;  %18 = sbr.rel (!%p16_p9) target bundleno = 3 (0x3), region = 79 }
 0x31c   :  { %677 = vsyncpa [#allocation3], 1 }
 0x31d   :  { %679 = vsyncpa [#allocation3 + $0x1], 1 }

</bundles_post_ra>
